<compile_context>
chip_gen: v7x
topology: tpu7x:2x2x1
jax: 0.10.0
libtpu: 0.0.40
codegen_flags: <defaults>
</compile_context>

<pallas_src>
import functools

import jax
import jax.numpy as jnp
from jax.experimental import pallas as pl
from jax.experimental.pallas import tpu as pltpu

EPS = 1e-5  # PyTorch BatchNorm2d default eps


# ---------------------------------------------------------------------------
# Param-slab layout: cols [0,F)=w1 (rows 0:E1), [F,F+E1)=w2,
#                    F+E1=g1, F+E1+1=beta1, F+E1+2=g2, F+E1+3=beta2.
# ---------------------------------------------------------------------------
def _slab_w(p_ref, e1, f):
    return p_ref[:e1, 0:f], p_ref[:, f:f + e1]          # (E1,F), (E2,E1)


# ---------------------------------------------------------------------------
# Kernels
# ---------------------------------------------------------------------------
def _fused_kernel(x_ref, p_ref, o_ref, *, e1, f, true_m, inv_m):
    """Whole problem in one VMEM block (small/medium M)."""
    m_pad = x_ref.shape[1]
    w1, w2 = _slab_w(p_ref, e1, f)
    g1 = p_ref[:e1, f + e1:f + e1 + 1]
    beta1 = p_ref[:e1, f + e1 + 1:f + e1 + 2]
    g2 = p_ref[:, f + e1 + 2:f + e1 + 3]
    beta2 = p_ref[:, f + e1 + 3:f + e1 + 4]

    x = x_ref[...]                                                     # (F, M_pad)

    # ----- stage 1: 1x1 conv (bias cancels under BN) + folded BN + ReLU -----
    h1 = jnp.dot(w1, x, preferred_element_type=jnp.float32)           # (E1, M_pad)
    mean1 = jnp.sum(h1, axis=1, keepdims=True) * inv_m
    var1 = jnp.maximum(
        jnp.sum(h1 * h1, axis=1, keepdims=True) * inv_m - mean1 * mean1, 0.0)
    scale1 = g1 * jax.lax.rsqrt(var1 + EPS)
    shift1 = beta1 - mean1 * scale1
    a = jnp.maximum(h1 * scale1 + shift1, 0.0)
    if m_pad != true_m:
        # Padded columns of x are zero -> h1 is zero there, but relu(shift1)
        # is not; zero them so the stage-2 statistics stay exact.
        lane = jax.lax.broadcasted_iota(jnp.int32, (1, m_pad), 1)
        a = jnp.where(lane < true_m, a, 0.0)

    # ----- stage 2 -----
    h2 = jnp.dot(w2, a, preferred_element_type=jnp.float32)           # (E2, M_pad)
    mean2 = jnp.sum(h2, axis=1, keepdims=True) * inv_m
    var2 = jnp.maximum(
        jnp.sum(h2 * h2, axis=1, keepdims=True) * inv_m - mean2 * mean2, 0.0)
    scale2 = g2 * jax.lax.rsqrt(var2 + EPS)
    shift2 = beta2 - mean2 * scale2
    out = jnp.maximum(h2 * scale2 + shift2, 0.0)                      # (E2, M_pad)

    # Store in row-major (M, E2): wrapper reshape is then free.
    o_ref[...] = out.T[:o_ref.shape[0], :]


def _stats1_kernel(x_ref, p_ref, sum_ref, sq_ref, *, e1, f):
    """Pass 1 (tiled path): per-channel sum / sum-of-squares of h1."""
    @pl.when(pl.program_id(0) == 0)
    def _init():
        sum_ref[...] = jnp.zeros_like(sum_ref)
        sq_ref[...] = jnp.zeros_like(sq_ref)

    w1, _ = _slab_w(p_ref, e1, f)
    h1 = jnp.dot(w1, x_ref[...], preferred_element_type=jnp.float32)  # (E1, T)
    sum_ref[...] += jnp.sum(h1, axis=1, keepdims=True)
    sq_ref[...] += jnp.sum(h1 * h1, axis=1, keepdims=True)


def _stats2_kernel(x_ref, p_ref, sc1_ref, sum_ref, sq_ref, *,
                   e1, f, true_m, tile_m):
    """Pass 2 (tiled path): recompute stage 1, accumulate stage-2 stats."""
    @pl.when(pl.program_id(0) == 0)
    def _init():
        sum_ref[...] = jnp.zeros_like(sum_ref)
        sq_ref[...] = jnp.zeros_like(sq_ref)

    w1, w2 = _slab_w(p_ref, e1, f)
    scale1, shift1 = sc1_ref[:, 0:1], sc1_ref[:, 1:2]

    h1 = jnp.dot(w1, x_ref[...], preferred_element_type=jnp.float32)  # (E1, T)
    a = jnp.maximum(h1 * scale1 + shift1, 0.0)
    lane = (pl.program_id(0) * tile_m
            + jax.lax.broadcasted_iota(jnp.int32, (1, tile_m), 1))
    a = jnp.where(lane < true_m, a, 0.0)   # keep padded columns out of the stats

    h2 = jnp.dot(w2, a, preferred_element_type=jnp.float32)           # (E2, T)
    sum_ref[...] += jnp.sum(h2, axis=1, keepdims=True)
    sq_ref[...] += jnp.sum(h2 * h2, axis=1, keepdims=True)


def _apply_kernel(x_ref, p_ref, sc1_ref, sc2_ref, o_ref, *, e1, f):
    """Pass 3 (tiled path): recompute and apply folded BN + ReLU, store (T, E2)."""
    w1, w2 = _slab_w(p_ref, e1, f)
    scale1, shift1 = sc1_ref[:, 0:1], sc1_ref[:, 1:2]
    scale2, shift2 = sc2_ref[:, 0:1], sc2_ref[:, 1:2]

    h1 = jnp.dot(w1, x_ref[...], preferred_element_type=jnp.float32)
    a = jnp.maximum(h1 * scale1 + shift1, 0.0)
    h2 = jnp.dot(w2, a, preferred_element_type=jnp.float32)
    out = jnp.maximum(h2 * scale2 + shift2, 0.0)                      # (E2, T)
    o_ref[...] = out.T                                                # (T, E2)


# ---------------------------------------------------------------------------
# Wrapper-side layout plumbing (fuses into the slab-producing XLA fusion).
# ---------------------------------------------------------------------------
def _round_up(n, m):
    return (n + m - 1) // m * m


def _pack_params(p):
    """Pack all small parameters into one (E2, F+E1+4) slab (one DMA)."""
    e1, _ = p["w1"].shape
    e2 = p["w2"].shape[0]

    def col(v):
        return jnp.pad(v, (0, e2 - v.shape[0]))[:, None]

    return jnp.concatenate(
        [jnp.pad(p["w1"], ((0, e2 - e1), (0, 0))),   # cols [0, F)
         p["w2"],                                    # cols [F, F+E1)
         col(p["g1"]), col(p["beta1"]),              # cols F+E1, F+E1+1
         col(p["g2"]), col(p["beta2"])],             # cols F+E1+2, F+E1+3
        axis=1).astype(jnp.float32)


def _prep_x(x, pos, m_pad):
    """(B,1,C,F) + pos  ->  lane-dense (F, M_pad) slab with zero-padded cols."""
    b, _, c, f = x.shape
    m = b * c
    xt = (x[:, 0] + pos[None]).reshape(m, f).T
    if m_pad > m:
        xt = jnp.pad(xt, ((0, 0), (0, m_pad - m)))
    return xt.astype(jnp.float32)


def _finalize_scale_shift(h_sum, h_sq, g, beta, inv_m):
    """Fold batch stats + affine into a single (scale, shift) pair, (E, 2)."""
    mean = h_sum * inv_m
    var = jnp.maximum(h_sq * inv_m - mean * mean, 0.0)
    scale = g[:, None] * jax.lax.rsqrt(var + EPS)
    shift = beta[:, None] - mean * scale
    return jnp.concatenate([scale, shift], axis=1)


@functools.partial(jax.jit,
                   static_argnames=("force_tiled", "tile_m", "fused_m_limit"))
def modified_patch_embedding_2d(x, params, *, force_tiled=False, tile_m=512,
                                fused_m_limit=4096):
    """x: (B, 1, C, F) float32 (same axis convention as the PyTorch module)."""
    B, one, C, F = x.shape
    assert one == 1
    E1 = params["w1"].shape[0]
    E2 = params["w2"].shape[0]
    M = B * C
    inv_m = 1.0 / M

    p_slab = _pack_params(params)                      # (E2, F+E1+4)
    vmem = pl.BlockSpec(memory_space=pltpu.MemorySpace.VMEM)

    if not force_tiled and _round_up(M, 128) <= fused_m_limit:
        # ---------- small/medium M: one launch, everything VMEM resident ----
        m_pad = _round_up(M, 128)
        x_pad = _prep_x(x, params["pos"], m_pad)       # (F, m_pad)
        out = pl.pallas_call(
            functools.partial(_fused_kernel, e1=E1, f=F, true_m=M, inv_m=inv_m),
            out_shape=jax.ShapeDtypeStruct((M, E2), jnp.float32),
            in_specs=[vmem, vmem],
            out_specs=vmem,
            compiler_params=pltpu.CompilerParams(
                # Let XLA fuse the (pos-add + transpose + pad) slab producer
                # into the pallas operand if it can (no-op otherwise).
                allow_input_fusion=[True, False]),
        )(x_pad, p_slab)
    else:
        # ---------- large M: three pipelined passes over M tiles ------------
        assert tile_m % 128 == 0
        m_pad = _round_up(M, tile_m)
        n_tiles = m_pad // tile_m
        x_pad = _prep_x(x, params["pos"], m_pad)       # (F, m_pad)

        x_spec = pl.BlockSpec((F, tile_m), lambda t: (0, t))
        p_spec = pl.BlockSpec(p_slab.shape, lambda t: (0, 0))
        sc1_spec = pl.BlockSpec((E1, 2), lambda t: (0, 0))
        sc2_spec = pl.BlockSpec((E2, 2), lambda t: (0, 0))

        def acc_spec(e):
            return pl.BlockSpec((e, 1), lambda t: (0, 0))

        # Pass 1: stage-1 batch statistics (resident accumulators).
        s1, q1 = pl.pallas_call(
            functools.partial(_stats1_kernel, e1=E1, f=F),
            out_shape=(jax.ShapeDtypeStruct((E1, 1), jnp.float32),
                       jax.ShapeDtypeStruct((E1, 1), jnp.float32)),
            grid=(n_tiles,),
            in_specs=[x_spec, p_spec],
            out_specs=(acc_spec(E1), acc_spec(E1)),
            compiler_params=pltpu.CompilerParams(
                dimension_semantics=("arbitrary",)),
        )(x_pad, p_slab)
        sc1 = _finalize_scale_shift(s1, q1, params["g1"], params["beta1"], inv_m)

        # Pass 2: stage-2 batch statistics (stage 1 recomputed per tile).
        s2, q2 = pl.pallas_call(
            functools.partial(_stats2_kernel, e1=E1, f=F, true_m=M,
                              tile_m=tile_m),
            out_shape=(jax.ShapeDtypeStruct((E2, 1), jnp.float32),
                       jax.ShapeDtypeStruct((E2, 1), jnp.float32)),
            grid=(n_tiles,),
            in_specs=[x_spec, p_spec, sc1_spec],
            out_specs=(acc_spec(E2), acc_spec(E2)),
            compiler_params=pltpu.CompilerParams(
                dimension_semantics=("arbitrary",)),
        )(x_pad, p_slab, sc1)
        sc2 = _finalize_scale_shift(s2, q2, params["g2"], params["beta2"], inv_m)

        # Pass 3: apply — "parallel" M axis so both v7x TensorCores are used.
        out = pl.pallas_call(
            functools.partial(_apply_kernel, e1=E1, f=F),
            out_shape=jax.ShapeDtypeStruct((M, E2), jnp.float32),
            grid=(n_tiles,),
            in_specs=[x_spec, p_spec, sc1_spec, sc2_spec],
            out_specs=pl.BlockSpec((tile_m, E2), lambda t: (t, 0)),
            compiler_params=pltpu.CompilerParams(
                dimension_semantics=("parallel",)),
        )(x_pad, p_slab, sc1, sc2)

    return out.reshape(B, C, E2)


# ---------------------------------------------------------------------------
# Parameters / reference
# ---------------------------------------------------------------------------
def init_params(key, emb_size=40, num_channels=62, num_freq_bands=5):
    """Deterministic synthetic parameters (shapes match the nn.Module __init__).

    BN gamma/beta are perturbed away from 1/0 so the folded scale/shift path
    is actually exercised.  b1/b2 are generated (and used by the reference) to
    prove the kernel's bias cancellation under train-mode BN.
    """
    e1 = emb_size // 2
    k = jax.random.split(key, 9)
    return {
        "pos": jax.random.normal(k[0], (num_channels, num_freq_bands), jnp.float32),
        "w1": 0.1 * jax.random.normal(k[1], (e1, num_freq_bands), jnp.float32),
        "b1": 0.1 * jax.random.normal(k[2], (e1,), jnp.float32),
        "g1": 1.0 + 0.1 * jax.random.normal(k[3], (e1,), jnp.float32),
        "beta1": 0.1 * jax.random.normal(k[4], (e1,), jnp.float32),
        "w2": 0.1 * jax.random.normal(k[5], (emb_size, e1), jnp.float32),
        "b2": 0.1 * jax.random.normal(k[6], (emb_size,), jnp.float32),
        "g2": 1.0 + 0.1 * jax.random.normal(k[7], (emb_size,), jnp.float32),
        "beta2": 0.1 * jax.random.normal(k[8], (emb_size,), jnp.float32),
    }


def reference(x, p):
    """Pure-JAX reference mirroring the PyTorch forward (train-mode BN).

    Includes conv biases b1/b2, which the kernel omits — they cancel exactly
    under the batch-mean subtraction, and this check proves it.
    """
    h = x[:, 0] + p["pos"][None]                                    # (B, C, F)
    h = jnp.einsum("bcf,ef->bce", h, p["w1"]) + p["b1"]
    m = h.mean(axis=(0, 1), keepdims=True)
    v = ((h - m) ** 2).mean(axis=(0, 1), keepdims=True)
    h = jnp.maximum((h - m) / jnp.sqrt(v + EPS) * p["g1"] + p["beta1"], 0.0)
    h = jnp.einsum("bce,de->bcd", h, p["w2"]) + p["b2"]
    m = h.mean(axis=(0, 1), keepdims=True)
    v = ((h - m) ** 2).mean(axis=(0, 1), keepdims=True)
    h = jnp.maximum((h - m) / jnp.sqrt(v + EPS) * p["g2"] + p["beta2"], 0.0)
    return h


if __name__ == "__main__":
    key = jax.random.PRNGKey(0)
    k_x, k_p, k_x2 = jax.random.split(key, 3)

    B, C, F, E = 2, 62, 5, 40  # module defaults: num_channels=62, num_freq_bands=5, emb_size=40
    params = init_params(k_p, emb_size=E, num_channels=C, num_freq_bands=F)

    # Default (small-B) path: single fused VMEM-resident kernel.
    x = jax.random.normal(k_x, (B, 1, C, F), jnp.float32)
    out = jax.block_until_ready(modified_patch_embedding_2d(x, params))
    ref = reference(x, params)
    assert out.shape == (B, C, E), out.shape
    assert jnp.allclose(out, ref, atol=1e-4, rtol=1e-4), \
        float(jnp.max(jnp.abs(out - ref)))

    # Tiled (large-B) path, forced at a small shape so multi-tile stats
    # accumulation, padded-column masking, edge-block clipping and the
    # "parallel" apply pass are all exercised.
    B2 = 5
    x2 = jax.random.normal(k_x2, (B2, 1, C, F), jnp.float32)
    out2 = jax.block_until_ready(
        modified_patch_embedding_2d(x2, params, force_tiled=True, tile_m=128))
    ref2 = reference(x2, params)
    assert out2.shape == (B2, C, E), out2.shape
    assert jnp.allclose(out2, ref2, atol=1e-4, rtol=1e-4), \
        float(jnp.max(jnp.abs(out2 - ref2)))

    print("KERNEL_OK")
</pallas_src>

<mosaic_0001>
module attributes {stable_mosaic.version = 11 : i64} {
  func.func @_fused_kernel(%arg0: memref<5x128xf32, #tpu.memory_space<vmem>>, %arg1: memref<40x29xf32, #tpu.memory_space<vmem>>, %arg2: memref<124x40xf32, #tpu.memory_space<vmem>>) attributes {dimension_semantics = [], scalar_prefetch = 0 : i64, scratch_operands = 0 : i64, tpu.core_type = #tpu.core_type<tc>} {
    %c0 = arith.constant 0 : index
    %c0_0 = arith.constant 0 : index
    %0 = vector.load %arg1[%c0, %c0_0] : memref<40x29xf32, #tpu.memory_space<vmem>>, vector<20x5xf32>
    %c0_1 = arith.constant 0 : index
    %c5 = arith.constant 5 : index
    %1 = vector.load %arg1[%c0_1, %c5] : memref<40x29xf32, #tpu.memory_space<vmem>>, vector<40x20xf32>
    %c0_2 = arith.constant 0 : index
    %c25 = arith.constant 25 : index
    %2 = vector.load %arg1[%c0_2, %c25] : memref<40x29xf32, #tpu.memory_space<vmem>>, vector<20x1xf32>
    %c0_3 = arith.constant 0 : index
    %c26 = arith.constant 26 : index
    %3 = vector.load %arg1[%c0_3, %c26] : memref<40x29xf32, #tpu.memory_space<vmem>>, vector<20x1xf32>
    %c0_4 = arith.constant 0 : index
    %c27 = arith.constant 27 : index
    %4 = vector.load %arg1[%c0_4, %c27] : memref<40x29xf32, #tpu.memory_space<vmem>>, vector<40x1xf32>
    %c0_5 = arith.constant 0 : index
    %c28 = arith.constant 28 : index
    %5 = vector.load %arg1[%c0_5, %c28] : memref<40x29xf32, #tpu.memory_space<vmem>>, vector<40x1xf32>
    %c0_6 = arith.constant 0 : index
    %c0_7 = arith.constant 0 : index
    %6 = vector.load %arg0[%c0_6, %c0_7] : memref<5x128xf32, #tpu.memory_space<vmem>>, vector<5x128xf32>
    %cst = arith.constant dense<0.000000e+00> : vector<20x128xf32>
    %7 = tpu.matmul %0, %6, %cst {dimension_numbers = #tpu.dot_dimension_numbers<[1], [0], [0], [1], [0, 0, 1, 1], [], []>} : vector<20x5xf32>, vector<5x128xf32>, vector<20x128xf32> -> vector<20x128xf32>
    %cst_8 = arith.constant dense<0.000000e+00> : vector<20xf32>
    %8 = vector.multi_reduction <add>, %7, %cst_8 [1] : vector<20x128xf32> to vector<20xf32>
    %9 = vector.shape_cast %8 : vector<20xf32> to vector<20x1xf32>
    %cst_9 = arith.constant 0.00806451589 : f32
    %10 = vector.broadcast %cst_9 : f32 to vector<20x1xf32>
    %11 = arith.mulf %9, %10 : vector<20x1xf32>
    %12 = arith.mulf %7, %7 : vector<20x128xf32>
    %cst_10 = arith.constant dense<0.000000e+00> : vector<20xf32>
    %13 = vector.multi_reduction <add>, %12, %cst_10 [1] : vector<20x128xf32> to vector<20xf32>
    %14 = vector.shape_cast %13 : vector<20xf32> to vector<20x1xf32>
    %cst_11 = arith.constant 0.00806451589 : f32
    %15 = vector.broadcast %cst_11 : f32 to vector<20x1xf32>
    %16 = arith.mulf %14, %15 : vector<20x1xf32>
    %17 = arith.mulf %11, %11 : vector<20x1xf32>
    %18 = arith.subf %16, %17 : vector<20x1xf32>
    %cst_12 = arith.constant 0.000000e+00 : f32
    %19 = vector.broadcast %cst_12 : f32 to vector<20x1xf32>
    %20 = arith.maximumf %18, %19 : vector<20x1xf32>
    %cst_13 = arith.constant 9.99999974E-6 : f32
    %21 = vector.broadcast %cst_13 : f32 to vector<20x1xf32>
    %22 = arith.addf %20, %21 : vector<20x1xf32>
    %23 = math.rsqrt %22 : vector<20x1xf32>
    %24 = arith.mulf %2, %23 : vector<20x1xf32>
    %25 = arith.mulf %11, %24 : vector<20x1xf32>
    %26 = arith.subf %3, %25 : vector<20x1xf32>
    %27 = vector.broadcast %24 : vector<20x1xf32> to vector<20x128xf32>
    %28 = arith.mulf %7, %27 : vector<20x128xf32>
    %29 = vector.broadcast %26 : vector<20x1xf32> to vector<20x128xf32>
    %30 = arith.addf %28, %29 : vector<20x128xf32>
    %cst_14 = arith.constant 0.000000e+00 : f32
    %31 = vector.broadcast %cst_14 : f32 to vector<20x128xf32>
    %32 = arith.maximumf %30, %31 : vector<20x128xf32>
    %33 = tpu.iota {dimensions = array<i32: 1>} : vector<1x128xi32>
    %c124_i32 = arith.constant 124 : i32
    %34 = vector.broadcast %c124_i32 : i32 to vector<1x128xi32>
    %35 = arith.cmpi slt, %33, %34 : vector<1x128xi32>
    %cst_15 = arith.constant 0.000000e+00 : f32
    %36 = vector.shape_cast %35 : vector<1x128xi1> to vector<1x128xi1>
    %37 = vector.broadcast %36 : vector<1x128xi1> to vector<20x128xi1>
    %38 = vector.broadcast %cst_15 : f32 to vector<20x128xf32>
    %39 = arith.select %37, %32, %38 : vector<20x128xi1>, vector<20x128xf32>
    %cst_16 = arith.constant dense<0.000000e+00> : vector<40x128xf32>
    %40 = tpu.matmul %1, %39, %cst_16 {dimension_numbers = #tpu.dot_dimension_numbers<[1], [0], [0], [1], [0, 0, 1, 1], [], []>} : vector<40x20xf32>, vector<20x128xf32>, vector<40x128xf32> -> vector<40x128xf32>
    %cst_17 = arith.constant dense<0.000000e+00> : vector<40xf32>
    %41 = vector.multi_reduction <add>, %40, %cst_17 [1] : vector<40x128xf32> to vector<40xf32>
    %42 = vector.shape_cast %41 : vector<40xf32> to vector<40x1xf32>
    %cst_18 = arith.constant 0.00806451589 : f32
    %43 = vector.broadcast %cst_18 : f32 to vector<40x1xf32>
    %44 = arith.mulf %42, %43 : vector<40x1xf32>
    %45 = arith.mulf %40, %40 : vector<40x128xf32>
    %cst_19 = arith.constant dense<0.000000e+00> : vector<40xf32>
    %46 = vector.multi_reduction <add>, %45, %cst_19 [1] : vector<40x128xf32> to vector<40xf32>
    %47 = vector.shape_cast %46 : vector<40xf32> to vector<40x1xf32>
    %cst_20 = arith.constant 0.00806451589 : f32
    %48 = vector.broadcast %cst_20 : f32 to vector<40x1xf32>
    %49 = arith.mulf %47, %48 : vector<40x1xf32>
    %50 = arith.mulf %44, %44 : vector<40x1xf32>
    %51 = arith.subf %49, %50 : vector<40x1xf32>
    %cst_21 = arith.constant 0.000000e+00 : f32
    %52 = vector.broadcast %cst_21 : f32 to vector<40x1xf32>
    %53 = arith.maximumf %51, %52 : vector<40x1xf32>
    %cst_22 = arith.constant 9.99999974E-6 : f32
    %54 = vector.broadcast %cst_22 : f32 to vector<40x1xf32>
    %55 = arith.addf %53, %54 : vector<40x1xf32>
    %56 = math.rsqrt %55 : vector<40x1xf32>
    %57 = arith.mulf %4, %56 : vector<40x1xf32>
    %58 = arith.mulf %44, %57 : vector<40x1xf32>
    %59 = arith.subf %5, %58 : vector<40x1xf32>
    %60 = vector.broadcast %57 : vector<40x1xf32> to vector<40x128xf32>
    %61 = arith.mulf %40, %60 : vector<40x128xf32>
    %62 = vector.broadcast %59 : vector<40x1xf32> to vector<40x128xf32>
    %63 = arith.addf %61, %62 : vector<40x128xf32>
    %cst_23 = arith.constant 0.000000e+00 : f32
    %64 = vector.broadcast %cst_23 : f32 to vector<40x128xf32>
    %65 = arith.maximumf %63, %64 : vector<40x128xf32>
    %66 = tpu.transpose %65, [1, 0] : vector<40x128xf32> -> vector<128x40xf32>
    %67 = vector.extract_strided_slice %66 {offsets = [0, 0], sizes = [124, 40], strides = [1, 1]} : vector<128x40xf32> to vector<124x40xf32>
    %c0_24 = arith.constant 0 : index
    %c0_25 = arith.constant 0 : index
    %68 = vector.load %arg2[%c0_24, %c0_25] : memref<124x40xf32, #tpu.memory_space<vmem>>, vector<124x40xf32>
    tpu.vector_store %arg2[%c0_24, %c0_25], %67 {strides = array<i32>} : memref<124x40xf32, #tpu.memory_space<vmem>>, vector<124x40xf32>,
    return
  }
}

</mosaic_0001>

<bundles_post_ra>
// kernel: modified_patch_embedding_2d.2
= control target key start
LH: loop header
LB: loop body
LE: loop exit
PB: predicated region body
PF: predicated region fallthrough
CT: control target
= control target key end

     0   :  { %s902_s0 = inlined_call_operand.vmem [shape: f32[40,29], index: 0, kind: input, shape index: {}]   ;;  %s903_s1 = inlined_call_operand.vmem [shape: f32[5,124], index: 1, kind: input, shape index: {}]   ;;  %s904_s2 = inlined_call_operand.<no memory space> [shape: f32[], index: 2, kind: input, shape index: {}]   ;;  %s905_s3 = inlined_call_operand.vmem [shape: f32[124,40], index: 3, kind: output, shape index: {}]  }
   0x1   :  { %v8_v0 = vstv %s904_s2 }
   0x2   :  { %v14_v1 = vlaneseq  ;;  %v661_v2 = vmov 0.0   ;;  %vm662_vm0 = vmmov 0   ;;  %v13_v3 = vld [vmem:[%s903_s1] sm:$0x1f]  ;;  %vm43_vm3 = vcmask 1044480   ;;  %v717_v10 = vld [vmem:[%s902_s0 + $0x8] sm:$0xff] }
   0x3   :  { %589 = vmatprep.subr.mxu0 %v661_v2  ;;  %591 = vmatprep.mubr.msk.f32.mxu0 %vm662_vm0, %v661_v2  ;;  %v709_v8 = vld [vmem:[%s902_s0] sm:$0xff]  ;;  %vm33_vm4 = vcmask 39936   ;;  %v725_v11 = vld [vmem:[%s902_s0 + $0x10] sm:$0xf]  ;;  %vm131_vm5 = vcmask 1043456   ;;  %v663_v23 = vmov 25  }
   0x4   :  { %v15_v4 = vshrl.u32 %v14_v1, 7  ;;  %v699_v5 = vand.u32 127, %v14_v1  ;;  %609 = vmatprep.mubr.msk.f32.mxu1 %vm662_vm0, %v661_v2  ;;  %639 = vset.pattern.permute.xlu0 %v663_v23  ;;  %s664_s20 = smov 1   ;;  %s665_s21 = smov 123   ;;  %v757_v57 = vld [vmem:[%s902_s0 + $0x10] sm:$0xff]  ;;  %v666_v58 = vmov 26  }
   0x5   :  { %638 = vset.pattern.permute.xlu1 %v663_v23  ;;  %v763_v59 = vld [vmem:[%s902_s0 + $0x20] sm:$0xff]  ;;  %vm247_vm7 = vcmask 162816   ;;  %vm543_vm8 = vcmask 326656   ;;  %vm559_vm9 = vcmask 322560  }
   0x6   :  { %vm17_vm1 = vcmp.lt.s32.totalorder %v15_v4, 5  ;;  %vm22_vm2 = vcmp.lt.s32.totalorder %v699_v5, 124  ;;  %v773_v4 = vld [vmem:[%s902_s0 + $0x18] sm:$0xff] }
   0x7   :  { %v18_v6 = vsel %vm17_vm1, %v13_v3, %v8_v0  ;;  %v667_v3 = vmov 0.0|0.0   ;;  %vm623_vm6 = vmpackc.low %vm22_vm2, %vm22_vm2 }
   0x8   :  { %v23_v7 = vsel %vm22_vm2, %v18_v6, %v8_v0  ;;  %625 = vmatprep.subr.bf16.mxu1 %v667_v3 }
   0x9   :  { %25 = vst [vmem:[#allocation7] sm:$0xff] %v23_v7 }
  0x10   :  { %v32_v9 = vld [vmem:[#allocation7] sm:$0x1f] }
  0x11   :  { %590 = vmatpush3.msk.msra.mxu0 %vm43_vm3, %v32_v9 }
  0x12   :  { %592 = vmatmul.mubr.msk.f32.vlgmr.msra.gmra.mrb[0].mxu0 %vm33_vm4, %v709_v8  ;;  %621 = vmatprep.subr.bf16.mxu0 %v667_v3 }
  0x13   :  { %594 = vmatprep.mubr.msk.f32.mxu0 %vm662_vm0, %v661_v2 }
  0x16   :  { %595 = vmatmul.mubr.msk.f32.gmra.mrb[2].mxu0 %vm33_vm4, %v717_v10 }
  0x17   :  { %597 = vmatprep.mubr.msk.f32.mxu0 %vm662_vm0, %v661_v2 }
  0x1a   :  { %598 = vmatmul.mubr.msk.f32.gmra.mrb[4].mxu0 %vm33_vm4, %v725_v11 }
  0x1b   :  { %606 = vmatprep.mubr.msk.f32.mxu0 %vm662_vm0, %v661_v2 }
  0xe5   :  { %v730_v12 = vpop.f32.mrb[0].mxu0 }
  0xe6   :  { %127 = vadd.xlane.f32.xlu0 %v730_v12  ;;  %v593_v13 = vpop.f32.mrb[1].mxu0  ;;  %v138_v14 = vmul.f32 %v730_v12, %v730_v12 }
  0xe8   :  { %141 = vadd.xlane.f32.xlu1 %v138_v14 }
  0xe9   :  { %v735_v15 = vpop.f32.mrb[2].mxu0 }
  0xea   :  { %129 = vadd.xlane.f32.xlu0 %v735_v15  ;;  %v596_v16 = vpop.f32.mrb[3].mxu0  ;;  %v139_v17 = vmul.f32 %v735_v15, %v735_v15 }
  0xec   :  { %143 = vadd.xlane.f32.xlu1 %v139_v17 }
  0xed   :  { %v740_v18 = vpop.f32.mrb[4].mxu0 }
  0xee   :  { %v132_v19 = vsel %vm131_vm5, %v740_v18, 0.0  ;;  %v599_v20 = vpop.f32.mrb[5].mxu0  ;;  %v140_v21 = vmul.f32 %v740_v18, %v740_v18 }
  0xef   :  { %133 = vadd.xlane.f32.xlu0 %v132_v19 }
  0xf0   :  { %v145_v22 = vsel %vm131_vm5, %v140_v21, 0.0 }
  0xf1   :  { %146 = vadd.xlane.f32.xlu1 %v145_v22 }
 0x173   :  { %v128_v24 = vpop.xlane.xlu0 %127 }
 0x174   :  { %v135_v25 = vmul.f32 0.008064516, %v128_v24 }
 0x175   :  { %v142_v26 = vpop.xlane.xlu1 %141 }
 0x176   :  { %v151_v27 = vmul.f32 %v135_v25, %v135_v25  ;;  %v148_v28 = vmul.f32 0.008064516, %v142_v26 }
 0x177   :  { %v130_v29 = vpop.xlane.xlu0 %129 }
 0x178   :  { %v154_v30 = vsub.f32 %v148_v28, %v151_v27  ;;  %v136_v31 = vmul.f32 0.008064516, %v130_v29 }
 0x179   :  { %v144_v32 = vpop.xlane.xlu1 %143 }
 0x17a   :  { %v157_v33 = vmax.f32 %v154_v30, 0.0  ;;  %v152_v34 = vmul.f32 %v136_v31, %v136_v31  ;;  %v149_v35 = vmul.f32 0.008064516, %v144_v32 }
 0x17c   :  { %v160_v36 = vadd.f32 1e-05, %v157_v33  ;;  %v155_v37 = vsub.f32 %v149_v35, %v152_v34  ;;  %v134_v38 = vpop.xlane.xlu0 %133 }
 0x17d   :  { %v137_v39 = vmul.f32 0.008064516, %v134_v38 }
 0x17e   :  { %645 = vrsqrt.f32 %v160_v36  ;;  %v158_v40 = vmax.f32 %v155_v37, 0.0  ;;  %v147_v41 = vpop.xlane.xlu1 %146 }
 0x17f   :  { %v153_v42 = vmul.f32 %v137_v39, %v137_v39  ;;  %v150_v43 = vmul.f32 0.008064516, %v147_v41 }
 0x180   :  { %v161_v44 = vadd.f32 1e-05, %v158_v40 }
 0x181   :  { %v156_v45 = vsub.f32 %v150_v43, %v153_v42  ;;  %v668_v43 = vmov 27  }
 0x182   :  { %647 = vrsqrt.f32 %v161_v44 }
 0x183   :  { %v159_v46 = vmax.f32 %v156_v45, 0.0 }
 0x185   :  { %v162_v47 = vadd.f32 1e-05, %v159_v46 }
 0x187   :  { %649 = vrsqrt.f32 %v162_v47 }
 0x188   :  { %v646_v48 = vpop.eup %645 }
 0x189   :  { %v166_v49 = vmul.f32 %v646_v48, %v709_v8 }
 0x18b   :  { %v169_v50 = vmul.f32 %v166_v49, %v135_v25 }
 0x18c   :  { %v648_v51 = vpop.eup %647 }
 0x18d   :  { %175 = vrot.lane.b32.xlu0 %v169_v50, %s664_s20  ;;  %v167_v52 = vmul.f32 %v648_v51, %v717_v10 }
 0x18f   :  { %v170_v53 = vmul.f32 %v167_v52, %v136_v31 }
 0x191   :  { %v650_v54 = vpop.eup %649  ;;  %177 = vrot.lane.b32.xlu1 %v170_v53, %s664_s20  ;;  %194 = vperm.xlu0 %639, %v167_v52  }
 0x192   :  { %v168_v55 = vmul.f32 %v650_v54, %v725_v11 }
 0x194   :  { %v171_v56 = vmul.f32 %v168_v55, %v137_v39 }
 0x195   :  { %199 = vperm.xlu0 %639, %v168_v55  }
 0x196   :  { %179 = vrot.lane.b32.xlu1 %v171_v56, %s664_s20 }
 0x199   :  { %239 = vrot.lane.b32.xlu0 %v717_v10, %s665_s21 }
 0x19a   :  { %189 = vperm.xlu1 %638, %v166_v49   ;;  %641 = vset.pattern.permute.xlu0 %v668_v43 }
 0x19d   :  { %241 = vrot.lane.b32.xlu0 %v757_v57, %s665_s21 }
 0x19e   :  { %640 = vset.pattern.permute.xlu1 %v666_v58 }
 0x1a1   :  { %245 = vrot.lane.b32.xlu0 %v763_v59, %s665_s21 }
 0x1ff   :  { %v176_v60 = vpop.permute.xlu0 %175 }
 0x200   :  { %v184_v61 = vsub.f32 %v709_v8, %v176_v60 }
 0x202   :  { %207 = vperm.xlu1 %640, %v184_v61  }
 0x203   :  { %v178_v62 = vpop.permute.xlu1 %177 }
 0x204   :  { %v185_v63 = vsub.f32 %v717_v10, %v178_v62 }
 0x206   :  { %212 = vperm.xlu1 %640, %v185_v63  }
 0x208   :  { %v180_v0 = vpop.permute.xlu1 %179 }
 0x209   :  { %v186_v1 = vsub.f32 %v725_v11, %v180_v0 }
 0x20b   :  { %217 = vperm.xlu1 %640, %v186_v1  }
 0x20f   :  { %237 = vrot.lane.b32.xlu1 %v709_v8, %s665_s21 }
 0x210   :  { %v195_v7 = vpop.permute.xlu0 %194  ;;  %642 = vset.pattern.permute.xlu1 %v668_v43 }
 0x211   :  { %v203_v11 = vmul.f32 %v195_v7, %v735_v15 }
 0x213   :  { %243 = vrot.lane.b32.xlu1 %v773_v4, %s665_s21 }
 0x214   :  { %v200_v17 = vpop.permute.xlu0 %199 }
 0x215   :  { %v204_v22 = vmul.f32 %v200_v17, %v740_v18 }
 0x218   :  { %v240_v26 = vpop.permute.xlu0 %239 }
 0x219   :  { %v190_v6 = vpop.permute.xlu1 %189 }
 0x21a   :  { %v202_v13 = vmul.f32 %v190_v6, %v730_v12 }
 0x21c   :  { %v242_v27 = vpop.permute.xlu0 %241 }
 0x220   :  { %v246_v5 = vpop.permute.xlu0 %245 }
 0x281   :  { %v208_v9 = vpop.permute.xlu1 %207 }
 0x282   :  { %v220_v14 = vadd.f32 %v208_v9, %v202_v13 }
 0x284   :  { %v223_v20 = vmax.f32 %v220_v14, 0.0 }
 0x285   :  { %v213_v16 = vpop.permute.xlu1 %212 }
 0x286   :  { %v221_v19 = vadd.f32 %v213_v16, %v203_v11 }
 0x288   :  { %v224_v21 = vmax.f32 %v221_v19, 0.0 }
 0x28a   :  { %v622_v23 = vpack.c.bf16 %v224_v21, %v223_v20  ;;  %v218_v24 = vpop.permute.xlu1 %217 }
 0x28b   :  { %v222_v25 = vadd.f32 %v218_v24, %v204_v22 }
 0x28c   :  { %624 = vmatpush3.bf16.msk.msra.mxu0 %vm623_vm6, %v622_v23  ;;  %627 = vmatpush3.bf16.msk.msra.mxu1 %vm623_vm6, %v622_v23 }
 0x28d   :  { %v225_v12 = vmax.f32 %v222_v25, 0.0  ;;  %604 = vmatprep.subr.mxu0 %v661_v2  ;;  %626 = vmatprep.subr.mxu1 %v661_v2 }
 0x28e   :  { %v238_v15 = vpop.permute.xlu1 %237 }
 0x28f   :  { %v233_v18 = vsel %vm22_vm2, %v225_v12, 0.0 }
 0x290   :  { %605 = vmatpush3.msk.msra.mxu0 %vm131_vm5, %v233_v18  ;;  %628 = vmatpush3.msk.msra.mxu1 %vm131_vm5, %v233_v18 }
 0x291   :  { %607 = vmatmul.mubr.msk.f32.vlgmr.msra.gmra.mrb[6].mxu0 %vm247_vm7, %v238_v15  ;;  %610 = vmatmul.mubr.msk.f32.vlgmr.msra.gmra.mrb[0].mxu1 %vm247_vm7, %v240_v26 }
 0x292   :  { %612 = vmatprep.mubr.msk.f32.mxu1 %vm662_vm0, %v661_v2  ;;  %v244_v28 = vpop.permute.xlu1 %243 }
 0x295   :  { %613 = vmatmul.mubr.msk.f32.gmra.mrb[2].mxu1 %vm247_vm7, %v242_v27 }
 0x296   :  { %615 = vmatprep.mubr.msk.f32.mxu1 %vm662_vm0, %v661_v2 }
 0x299   :  { %616 = vmatmul.mubr.msk.f32.gmra.mrb[4].mxu1 %vm247_vm7, %v244_v28 }
 0x29a   :  { %618 = vmatprep.mubr.msk.f32.mxu1 %vm662_vm0, %v661_v2 }
 0x29d   :  { %619 = vmatmul.mubr.msk.f32.gmra.mrb[6].mxu1 %vm247_vm7, %v246_v5 }
 0x364   :  { %v794_v29 = vpop.f32.mrb[6].mxu0  ;;  %v796_v30 = vpop.f32.mrb[0].mxu1 }
 0x365   :  { %353 = vadd.xlane.f32.xlu0 %v796_v30  ;;  %351 = vadd.xlane.f32.xlu1 %v794_v29  ;;  %v611_v31 = vpop.f32.mrb[1].mxu1  ;;  %v366_v32 = vmul.f32 %v794_v29, %v794_v29  ;;  %v608_v33 = vpop.f32.mrb[7].mxu0  ;;  %v367_v34 = vmul.f32 %v796_v30, %v796_v30 }
 0x368   :  { %v804_v35 = vpop.f32.mrb[2].mxu1 }
 0x369   :  { %373 = vadd.xlane.f32.xlu1 %v367_v34  ;;  %371 = vadd.xlane.f32.xlu0 %v366_v32  ;;  %v614_v2 = vpop.f32.mrb[3].mxu1  ;;  %v368_v36 = vmul.f32 %v804_v35, %v804_v35 }
 0x36c   :  { %v808_v37 = vpop.f32.mrb[4].mxu1 }
 0x36d   :  { %355 = vadd.xlane.f32.xlu0 %v804_v35  ;;  %375 = vadd.xlane.f32.xlu1 %v368_v36  ;;  %v617_v38 = vpop.f32.mrb[5].mxu1  ;;  %v369_v39 = vmul.f32 %v808_v37, %v808_v37 }
 0x370   :  { %v813_v40 = vpop.f32.mrb[6].mxu1 }
 0x371   :  { %357 = vadd.xlane.f32.xlu0 %v808_v37  ;;  %377 = vadd.xlane.f32.xlu1 %v369_v39  ;;  %v620_v41 = vpop.f32.mrb[7].mxu1  ;;  %v370_v42 = vmul.f32 %v813_v40, %v813_v40 }
 0x375   :  { %359 = vadd.xlane.f32.xlu0 %v813_v40 }
 0x379   :  { %379 = vadd.xlane.f32.xlu0 %v370_v42 }
 0x3f2   :  { %v354_v44 = vpop.xlane.xlu0 %353  ;;  %v352_v45 = vpop.xlane.xlu1 %351 }
 0x3f3   :  { %v362_v46 = vmul.f32 0.008064516, %v354_v44  ;;  %v361_v47 = vmul.f32 0.008064516, %v352_v45  ;;  %v669_v45 = vmov 28  }
 0x3f5   :  { %v386_v48 = vmul.f32 %v361_v47, %v361_v47  ;;  %v387_v51 = vmul.f32 %v362_v46, %v362_v46 }
 0x3f6   :  { %v374_v49 = vpop.xlane.xlu1 %373  ;;  %v372_v50 = vpop.xlane.xlu0 %371 }
 0x3f7   :  { %v382_v52 = vmul.f32 0.008064516, %v374_v49  ;;  %v381_v53 = vmul.f32 0.008064516, %v372_v50 }
 0x3f9   :  { %v392_v54 = vsub.f32 %v382_v52, %v387_v51  ;;  %v391_v55 = vsub.f32 %v381_v53, %v386_v48 }
 0x3fa   :  { %v356_v56 = vpop.xlane.xlu0 %355  ;;  %v376_v58 = vpop.xlane.xlu1 %375 }
 0x3fb   :  { %v397_v60 = vmax.f32 %v392_v54, 0.0  ;;  %v396_v61 = vmax.f32 %v391_v55, 0.0  ;;  %v363_v62 = vmul.f32 0.008064516, %v356_v56  ;;  %v383_v63 = vmul.f32 0.008064516, %v376_v58 }
 0x3fd   :  { %v402_v0 = vadd.f32 1e-05, %v397_v60  ;;  %v401_v1 = vadd.f32 1e-05, %v396_v61  ;;  %v388_v3 = vmul.f32 %v363_v62, %v363_v62 }
 0x3fe   :  { %v358_v6 = vpop.xlane.xlu0 %357  ;;  %v378_v7 = vpop.xlane.xlu1 %377 }
 0x3ff   :  { %651 = vrsqrt.f32 %v402_v0  ;;  %v393_v9 = vsub.f32 %v383_v63, %v388_v3  ;;  %v364_v13 = vmul.f32 0.008064516, %v358_v6  ;;  %v384_v11 = vmul.f32 0.008064516, %v378_v7 }
 0x400   :  { %653 = vrsqrt.f32 %v401_v1 }
 0x401   :  { %v398_v14 = vmax.f32 %v393_v9, 0.0  ;;  %v389_v16 = vmul.f32 %v364_v13, %v364_v13 }
 0x402   :  { %v360_v17 = vpop.xlane.xlu0 %359 }
 0x403   :  { %v403_v19 = vadd.f32 1e-05, %v398_v14  ;;  %v394_v20 = vsub.f32 %v384_v11, %v389_v16  ;;  %v365_v21 = vmul.f32 0.008064516, %v360_v17 }
 0x405   :  { %655 = vrsqrt.f32 %v403_v19  ;;  %v399_v22 = vmax.f32 %v394_v20, 0.0  ;;  %v390_v25 = vmul.f32 %v365_v21, %v365_v21 }
 0x406   :  { %v380_v23 = vpop.xlane.xlu0 %379 }
 0x407   :  { %v404_v24 = vadd.f32 1e-05, %v399_v22  ;;  %v385_v12 = vmul.f32 0.008064516, %v380_v23 }
 0x409   :  { %v652_v15 = vpop.eup %651  ;;  %657 = vrsqrt.f32 %v404_v24  ;;  %v395_v26 = vsub.f32 %v385_v12, %v390_v25 }
 0x40a   :  { %v654_v18 = vpop.eup %653  ;;  %v412_v27 = vmul.f32 %v652_v15, %v717_v10 }
 0x40b   :  { %v400_v28 = vmax.f32 %v395_v26, 0.0  ;;  %v411_v5 = vmul.f32 %v654_v18, %v709_v8 }
 0x40c   :  { %v417_v31 = vmul.f32 %v412_v27, %v362_v46 }
 0x40d   :  { %v405_v32 = vadd.f32 1e-05, %v400_v28  ;;  %v416_v33 = vmul.f32 %v411_v5, %v361_v47 }
 0x40e   :  { %428 = vrot.lane.b32.xlu0 %v417_v31, %s664_s20 }
 0x40f   :  { %v656_v34 = vpop.eup %655  ;;  %659 = vrsqrt.f32 %v405_v32  ;;  %426 = vrot.lane.b32.xlu1 %v416_v33, %s664_s20 }
 0x410   :  { %v413_v2 = vmul.f32 %v656_v34, %v757_v57 }
 0x412   :  { %448 = vperm.xlu0 %641, %v411_v5   ;;  %v418_v36 = vmul.f32 %v413_v2, %v363_v62 }
 0x413   :  { %v658_v38 = vpop.eup %657 }
 0x414   :  { %430 = vrot.lane.b32.xlu1 %v418_v36, %s664_s20  ;;  %v414_v39 = vmul.f32 %v658_v38, %v773_v4 }
 0x416   :  { %458 = vperm.xlu0 %641, %v413_v2   ;;  %v419_v41 = vmul.f32 %v414_v39, %v364_v13 }
 0x418   :  { %432 = vrot.lane.b32.xlu1 %v419_v41, %s664_s20 }
 0x419   :  { %v660_v42 = vpop.eup %659 }
 0x41a   :  { %463 = vperm.xlu0 %641, %v414_v39   ;;  %v415_v43 = vmul.f32 %v660_v42, %v763_v59 }
 0x41c   :  { %v420_v44 = vmul.f32 %v415_v43, %v365_v21 }
 0x41e   :  { %468 = vperm.xlu0 %641, %v415_v43   ;;  %434 = vrot.lane.b32.xlu1 %v420_v44, %s664_s20 }
 0x422   :  { %453 = vperm.xlu1 %642, %v412_v27   ;;  %644 = vset.pattern.permute.xlu0 %v669_v45 }
 0x426   :  { %643 = vset.pattern.permute.xlu1 %v669_v45 }
 0x480   :  { %v429_v48 = vpop.permute.xlu0 %428 }
 0x481   :  { %v427_v46 = vpop.permute.xlu1 %426  ;;  %v442_v49 = vsub.f32 %v717_v10, %v429_v48 }
 0x482   :  { %v441_v47 = vsub.f32 %v709_v8, %v427_v46 }
 0x484   :  { %478 = vperm.xlu1 %643, %v441_v47  }
 0x486   :  { %v431_v50 = vpop.permute.xlu1 %430 }
 0x487   :  { %v443_v51 = vsub.f32 %v757_v57, %v431_v50 }
 0x488   :  { %483 = vperm.xlu1 %643, %v442_v49  }
 0x48a   :  { %v433_v52 = vpop.permute.xlu1 %432 }
 0x48b   :  { %v444_v53 = vsub.f32 %v773_v4, %v433_v52 }
 0x48c   :  { %488 = vperm.xlu1 %643, %v443_v51  }
 0x490   :  { %493 = vperm.xlu1 %643, %v444_v53   ;;  %v435_v54 = vpop.permute.xlu1 %434 }
 0x491   :  { %v445_v55 = vsub.f32 %v763_v59, %v435_v54  ;;  %v449_v56 = vpop.permute.xlu0 %448 }
 0x492   :  { %v471_v8 = vmul.f32 %v449_v56, %v794_v29 }
 0x493   :  { %498 = vperm.xlu0 %644, %v445_v55  }
 0x495   :  { %v459_v60 = vpop.permute.xlu0 %458 }
 0x496   :  { %v473_v4 = vmul.f32 %v459_v60, %v804_v35 }
 0x499   :  { %v464_v0 = vpop.permute.xlu0 %463 }
 0x49a   :  { %v474_v7 = vmul.f32 %v464_v0, %v808_v37 }
 0x49d   :  { %v469_v9 = vpop.permute.xlu0 %468 }
 0x4a1   :  { %v454_v58 = vpop.permute.xlu1 %453 }
 0x4a2   :  { %v472_v62 = vmul.f32 %v454_v58, %v796_v30  ;;  %v475_v30 = vmul.f32 %v469_v9, %v813_v40 }
 0x503   :  { %v479_v61 = vpop.permute.xlu1 %478 }
 0x504   :  { %v501_v10 = vadd.f32 %v479_v61, %v471_v8 }
 0x506   :  { %v506_v63 = vmax.f32 %v501_v10, 0.0 }
 0x507   :  { %v484_v57 = vpop.permute.xlu1 %483 }
 0x508   :  { %v502_v1 = vadd.f32 %v484_v57, %v472_v62  ;;  %511 = vxpose.xlu1.b32.start [1/5] (short) %v506_v63, 128 }
 0x50a   :  { %v507_v3 = vmax.f32 %v502_v1, 0.0 }
 0x50b   :  { %v489_v6 = vpop.permute.xlu1 %488 }
 0x50c   :  { %v503_v59 = vadd.f32 %v489_v6, %v473_v4  ;;  %512 = vxpose.xlu1.b32.cont [2/5] (short) %v507_v3, 128 }
 0x50e   :  { %v508_v29 = vmax.f32 %v503_v59, 0.0 }
 0x50f   :  { %v494_v13 = vpop.permute.xlu1 %493 }
 0x510   :  { %v504_v11 = vadd.f32 %v494_v13, %v474_v7  ;;  %513 = vxpose.xlu1.b32.cont [3/5] (short) %v508_v29, 128 }
 0x512   :  { %v509_v14 = vmax.f32 %v504_v11, 0.0  ;;  %v499_v16 = vpop.permute.xlu0 %498 }
 0x513   :  { %v505_v17 = vadd.f32 %v499_v16, %v475_v30 }
 0x514   :  { %514 = vxpose.xlu1.b32.cont [4/5] (short) %v509_v14, 128 }
 0x515   :  { %v510_v19 = vmax.f32 %v505_v17, 0.0 }
 0x518   :  { %515 = vxpose.xlu1.b32.end [5/5] (short) %v510_v19, 128 }
 0x588   :  { %v527_v35 = vpop.trf.xlu1 }
 0x589   :  { %544 = vst.msk [vmem:[%s905_s3] sm:$0xff] %vm543_vm8, %v527_v35 }
 0x58c   :  { %v528_v37 = vpop.trf.xlu1 }
 0x58d   :  { %545 = vst.msk [vmem:[%s905_s3 + $0x8] sm:$0xff] %vm543_vm8, %v528_v37 }
 0x590   :  { %v529_v40 = vpop.trf.xlu1 }
 0x591   :  { %546 = vst.msk [vmem:[%s905_s3 + $0x10] sm:$0xff] %vm543_vm8, %v529_v40 }
 0x594   :  { %v530_v20 = vpop.trf.xlu1 }
 0x595   :  { %547 = vst.msk [vmem:[%s905_s3 + $0x18] sm:$0xff] %vm543_vm8, %v530_v20 }
 0x598   :  { %v531_v21 = vpop.trf.xlu1 }
 0x599   :  { %548 = vst.msk [vmem:[%s905_s3 + $0x20] sm:$0xff] %vm543_vm8, %v531_v21 }
 0x59c   :  { %v532_v22 = vpop.trf.xlu1 }
 0x59d   :  { %549 = vst.msk [vmem:[%s905_s3 + $0x28] sm:$0xff] %vm543_vm8, %v532_v22 }
 0x5a0   :  { %v533_v23 = vpop.trf.xlu1 }
 0x5a1   :  { %550 = vst.msk [vmem:[%s905_s3 + $0x30] sm:$0xff] %vm543_vm8, %v533_v23 }
 0x5a4   :  { %v534_v24 = vpop.trf.xlu1 }
 0x5a5   :  { %551 = vst.msk [vmem:[%s905_s3 + $0x38] sm:$0xff] %vm543_vm8, %v534_v24 }
 0x5a8   :  { %v535_v25 = vpop.trf.xlu1 }
 0x5a9   :  { %552 = vst.msk [vmem:[%s905_s3 + $0x40] sm:$0xff] %vm543_vm8, %v535_v25 }
 0x5ac   :  { %v536_v12 = vpop.trf.xlu1 }
 0x5ad   :  { %553 = vst.msk [vmem:[%s905_s3 + $0x48] sm:$0xff] %vm543_vm8, %v536_v12 }
 0x5b0   :  { %v537_v15 = vpop.trf.xlu1 }
 0x5b1   :  { %554 = vst.msk [vmem:[%s905_s3 + $0x50] sm:$0xff] %vm543_vm8, %v537_v15 }
 0x5b4   :  { %v538_v26 = vpop.trf.xlu1 }
 0x5b5   :  { %555 = vst.msk [vmem:[%s905_s3 + $0x58] sm:$0xff] %vm543_vm8, %v538_v26 }
 0x5b8   :  { %v539_v18 = vpop.trf.xlu1 }
 0x5b9   :  { %556 = vst.msk [vmem:[%s905_s3 + $0x60] sm:$0xff] %vm543_vm8, %v539_v18 }
 0x5bc   :  { %v540_v27 = vpop.trf.xlu1 }
 0x5bd   :  { %557 = vst.msk [vmem:[%s905_s3 + $0x68] sm:$0xff] %vm543_vm8, %v540_v27 }
 0x5c0   :  { %v541_v28 = vpop.trf.xlu1 }
 0x5c1   :  { %558 = vst.msk [vmem:[%s905_s3 + $0x70] sm:$0xff] %vm543_vm8, %v541_v28 }
 0x5c4   :  { %v542_v5 = vpop.trf.xlu1 }
 0x5c5   :  { %560 = vst.msk [vmem:[%s905_s3 + $0x78] sm:$0xf] %vm559_vm9, %v542_v5 }

</bundles_post_ra>
